<compile_context>
chip_gen: v5e
topology: v5e:2x2
jax: 0.10.0
libtpu: 0.0.40
codegen_flags: <defaults>
</compile_context>

<pallas_src>
import functools

import jax
import jax.numpy as jnp
from jax.experimental import pallas as pl
from jax.experimental.pallas import tpu as pltpu


def _scatter_row_kernel(idx_ref, dst_hbm_ref, val_ref, out_ref):
    """One scattered row per grid step.

    idx_ref     : (N,) int32 SMEM  (scalar prefetch; consumed by index_maps)
    dst_hbm_ref : raw HBM ref of the aliased destination (never touched here)
    val_ref     : (1, 1, C_pad) f32 VMEM  -- value row i
    out_ref     : (1, 1, C_pad) f32 VMEM  -- written back to output row idx[i]
    """
    del idx_ref, dst_hbm_ref  # only used by the BlockSpec index maps / alias
    out_ref[...] = val_ref[...]


@functools.partial(jax.jit, donate_argnums=(0,))
def index_put_3d_nonaccumulate(inp, index, value):
    """inp: (R, D1, D2) f32, index: (N,) int, value: (N, D1, D2) f32."""
    R, D1, D2 = inp.shape
    N = index.shape[0]
    C = D1 * D2

    # TODO(synk): torch uses int64 indices; TPU Pallas has no practical int64
    # path, so indices are narrowed to int32.
    idx = index.astype(jnp.int32)
    idx = jnp.where(idx < 0, idx + R, idx)   # torch-style negative indices
    # TODO(synk): out-of-range indices are clamped instead of raising like torch.
    idx = jnp.clip(idx, 0, R - 1)

    # Lane-dense layout: flatten trailing dims into one row. Only pad the lane
    # axis when it is not already a multiple of 128 (padding the full input
    # would add an R*C copy and break the donation/alias benefit).
    LANE = 128
    C_pad = -(-C // LANE) * LANE
    inp3 = inp.reshape(R, 1, C)
    val3 = value.reshape(N, 1, C)
    if C_pad != C:
        inp3 = jnp.pad(inp3, ((0, 0), (0, 0), (0, C_pad - C)))
        val3 = jnp.pad(val3, ((0, 0), (0, 0), (0, C_pad - C)))

    out3 = pl.pallas_call(
        _scatter_row_kernel,
        out_shape=jax.ShapeDtypeStruct((R, 1, C_pad), inp.dtype),
        grid_spec=pltpu.PrefetchScalarGridSpec(
            num_scalar_prefetch=1,
            grid=(N,),
            in_specs=[
                # Aliased destination: stays in HBM, never streamed into VMEM.
                pl.BlockSpec(memory_space=pl.ANY),
                # Value row i.
                pl.BlockSpec((1, 1, C_pad), lambda i, idx_ref: (i, 0, 0)),
            ],
            # Data-dependent scatter: output block goes to row idx[i].
            out_specs=pl.BlockSpec(
                (1, 1, C_pad), lambda i, idx_ref: (idx_ref[i], 0, 0)),
        ),
        # Alias the destination buffer to the output: untouched rows are kept
        # in place in HBM (operand indices count the scalar-prefetch arg).
        input_output_aliases={1: 0},
        compiler_params=pltpu.CompilerParams(
            # Sequential grid preserves last-write-wins for duplicate indices.
            dimension_semantics=("arbitrary",),
        ),
    )(idx, inp3, val3)

    return out3[:, :, :C].reshape(R, D1, D2)


if __name__ == "__main__":
    key = jax.random.PRNGKey(0)
    k1, k2 = jax.random.split(key, 2)

    R, D1, D2, N = 10, 8, 16, 5    # flattened trailing dims = 128 lanes
    inp = jax.random.normal(k1, (R, D1, D2), dtype=jnp.float32)
    value = jax.random.normal(k2, (N, D1, D2), dtype=jnp.float32)
    index = jnp.array([1, 3, 7, 0, 9], dtype=jnp.int32)

    # Pure-JAX reference (overwrite semantics), computed BEFORE the kernel call
    # because `inp` is donated to the kernel.
    ref = inp.at[index].set(value)
    ref = jax.block_until_ready(ref)

    out = index_put_3d_nonaccumulate(inp, index, value)
    out = jax.block_until_ready(out)

    assert out.shape == ref.shape and out.dtype == ref.dtype
    assert jnp.array_equal(out, ref), "mismatch vs index_put(accumulate=False)"
    print("KERNEL_OK")
</pallas_src>

<mosaic_0001>
module attributes {stable_mosaic.version = 11 : i64} {
  func.func @_scatter_row_kernel(%arg0: i32, %arg1: memref<5xi32, #tpu.memory_space<smem>>, %arg2: memref<10x1x128xf32, #tpu.memory_space<any>>, %arg3: memref<1x1x128xf32, #tpu.memory_space<vmem>>, %arg4: memref<1x1x128xf32, #tpu.memory_space<vmem>>) attributes {dimension_semantics = [#tpu.dimension_semantics<arbitrary>], iteration_bounds = array<i64: 5>, scalar_prefetch = 1 : i64, scratch_operands = 0 : i64, tpu.core_type = #tpu.core_type<tc>, window_params = [{}, {transform_indices = @transform_1, window_bounds = array<i64: 1, 1, 128>}, {transform_indices = @transform_2, window_bounds = array<i64: 1, 1, 128>}]} {
    %c0 = arith.constant 0 : index
    %c0_0 = arith.constant 0 : index
    %c0_1 = arith.constant 0 : index
    %0 = vector.load %arg3[%c0, %c0_0, %c0_1] : memref<1x1x128xf32, #tpu.memory_space<vmem>>, vector<1x1x128xf32>
    %c0_2 = arith.constant 0 : index
    %c0_3 = arith.constant 0 : index
    %c0_4 = arith.constant 0 : index
    %1 = vector.load %arg4[%c0_2, %c0_3, %c0_4] : memref<1x1x128xf32, #tpu.memory_space<vmem>>, vector<1x1x128xf32>
    tpu.vector_store %arg4[%c0_2, %c0_3, %c0_4], %0 {strides = array<i32>} : memref<1x1x128xf32, #tpu.memory_space<vmem>>, vector<1x1x128xf32>,
    return
  }
  func.func @transform_1(%arg0: i32, %arg1: memref<5xi32, #tpu.memory_space<smem>>) -> (i32, i32, i32) {
    %c0_i32 = arith.constant 0 : i32
    %c0_i32_0 = arith.constant 0 : i32
    %c0_i32_1 = arith.constant 0 : i32
    return %arg0, %c0_i32, %c0_i32_0 : i32, i32, i32
  }
  func.func @transform_2(%arg0: i32, %arg1: memref<5xi32, #tpu.memory_space<smem>>) -> (i32, i32, i32) {
    %0 = arith.index_cast %arg0 : i32 to index
    %1 = memref.load %arg1[%0] : memref<5xi32, #tpu.memory_space<smem>>
    %c0_i32 = arith.constant 0 : i32
    %c0_i32_0 = arith.constant 0 : i32
    %c0_i32_1 = arith.constant 0 : i32
    return %1, %c0_i32, %c0_i32_0 : i32, i32, i32
  }
}

</mosaic_0001>

<bundles_post_ra>
// kernel: index_put_3d_nonaccumulate.1
= control target key start
LH: loop header
LB: loop body
LE: loop exit
PB: predicated region body
PF: predicated region fallthrough
CT: control target
= control target key end

     0   :  { %s209_s15 = smov [#allocation3]   ;;  %s239_s0 = inlined_call_operand.vmem [shape: s32[5], index: 0, kind: input, shape index: {}]   ;;  %s240_s1 = inlined_call_operand.vmem [shape: f32[10,1,128], index: 1, kind: input, shape index: {}, may-alias: {1,3}]   ;;  %s241_s2 = inlined_call_operand.vmem [shape: f32[5,1,128], index: 2, kind: input, shape index: {}]   ;;  %s242_s3 = inlined_call_operand.vmem [shape: f32[10,1,128], index: 3, kind: output, shape index: {}, may-alias: {1,3}]  }
   0x1   :  { %s9_s14 = sshll.u32 %s239_s0, 4  ;;  %s10_s14 = int_to_ptr.vmem [resolvable:$true] %s9_s14 }
   0x2   :  { %12 = dma.vmem_to_smem %s10_s14, 16, %s209_s15, [#allocation2] }
   0x3   :  { %203 = dma.done.wait [#allocation2], 16 }
   0x4   :  { %204 = vsyncadd [#allocation2], 4294967280 }
   0x5   :  { %15 = sfence }
   0x6   :  { %s205_s16 = smov 0  }
   0x7 LB: > { %s171_s1 = sadd.s32 4294967295, %s207_s16   ;;  %p175_p0 = scmp.ge.s32.totalorder %s207_s16, 1  ;;  %s207_s16 = sphi %s205_s16, %s21_s16  }
   0x8   : > { %p97_p1 = scmp.lt.s32.totalorder %s207_s16, 6 }
   0xa   : > { %p98_p2 = pnand %p175_p0, %p97_p1 }
   0xb   : > { %p114_p3 = scmp.lt.s32.totalorder (!%p98_p2), %s171_s1, 4  ;;  %s117_s17 = sld [smem:[#allocation3 + %s171_s1]] (!%p98_p2) }
   0xc   : > { %101 = sbr.rel (%p98_p2) target bundleno = 22 (0x16), region = 24 }
  0x11   : > { %s244_s1 = smov (!%p114_p3, %s171_s1), 4  ;;  %p118_p4 = scmp.lt.s32.totalorder %s117_s17, 9 }
  0x12   : > { %s116_s19 = scalar_lea.vmem %s241_s2, %s244_s1 }
  0x13   : > { %s246_s17 = smov (!%p118_p4, %s117_s17), 9  ;;  %v122_v0 = vld [vmem:[%s116_s19] sm:$0x1] }
  0x14   : > { %s120_s22 = scalar_lea.vmem %s242_s3, %s246_s17 }
  0x15   : > { %123 = vst [vmem:[%s120_s22] sm:$0x1] %v122_v0 }
  0x16 PF: > { %s21_s16 = sadd.s32 1, %s207_s16  }
  0x17   : > { %p18_p5 = scmp.ge.s32.totalorder %s21_s16, 7  }
  0x19   :  { %20 = sbr.rel (!%p18_p5) target bundleno = 7 (0x7), region = 54 }

</bundles_post_ra>
